<compile_context>
chip_gen: v7x
topology: tpu7x:2x2x1
jax: 0.10.0
libtpu: 0.0.40
codegen_flags: <defaults>
</compile_context>

<pallas_src>
from functools import partial

import jax
import jax.numpy as jnp
from jax.experimental import pallas as pl
from jax.experimental.pallas import tpu as pltpu

HIDDEN = 128


def _round_up(n, m):
    return ((n + m - 1) // m) * m


def _mlp_kernel(x_ref, w1_ref, b1_ref, w2_ref, b2_ref, w3_ref, b3_ref, o_ref):
    # x block: (bm, in_dim) f32; weights bf16; biases f32 (1, width).
    x = x_ref[...]

    # fc1 + relu   (bf16 operands into the MXU, f32 accumulate / elementwise)
    h1 = jnp.dot(x.astype(jnp.bfloat16), w1_ref[...],
                 preferred_element_type=jnp.float32)
    h1 = jnp.maximum(h1 + b1_ref[...], 0.0)

    # fc2 + relu
    h2 = jnp.dot(h1.astype(jnp.bfloat16), w2_ref[...],
                 preferred_element_type=jnp.float32)
    h2 = jnp.maximum(h2 + b2_ref[...], 0.0)

    # fc3 (raw logits, no softmax -- matches map_predict.forward)
    logits = jnp.dot(h2.astype(jnp.bfloat16), w3_ref[...],
                     preferred_element_type=jnp.float32)
    o_ref[...] = (logits + b3_ref[...]).astype(o_ref.dtype)


def _choose_block_m(B, target_bm):
    """Large row block (HBM/overhead bound), multiple of 8, >=2 blocks when
    possible so the v7x megacore can use both TensorCores."""
    half = _round_up(pl.cdiv(B, 2), 8)
    return max(8, min(target_bm, half))


@partial(jax.jit, static_argnames=("block_m",))
def map_predict_forward(x, params, *, block_m=4096):
    """x: (B, input_dim) f32. Returns (B, output_dim) f32 logits."""
    w1, b1, w2, b2, w3, b3 = params
    B, in_dim = x.shape
    out_dim = w3.shape[1]

    bm = _choose_block_m(B, block_m)
    num_blocks = pl.cdiv(B, bm)          # ragged last block handled by Pallas

    # Weights/biases: constant block index -> DMA'd once, resident in VMEM.
    const = lambda i: (0, 0)
    row_block = lambda i: (i, 0)

    grid_spec = pltpu.PrefetchScalarGridSpec(
        num_scalar_prefetch=0,
        grid=(num_blocks,),
        in_specs=[
            pl.BlockSpec((bm, in_dim), row_block),       # x
            pl.BlockSpec((in_dim, HIDDEN), const),       # w1 (bf16)
            pl.BlockSpec((1, HIDDEN), const),            # b1
            pl.BlockSpec((HIDDEN, HIDDEN), const),       # w2 (bf16)
            pl.BlockSpec((1, HIDDEN), const),            # b2
            pl.BlockSpec((HIDDEN, out_dim), const),      # w3 (bf16)
            pl.BlockSpec((1, out_dim), const),           # b3
        ],
        out_specs=pl.BlockSpec((bm, out_dim), row_block),
    )

    flops = 2 * B * (in_dim * HIDDEN + HIDDEN * HIDDEN + HIDDEN * out_dim)
    bytes_accessed = (
        B * in_dim * 4                                                  # x
        + (in_dim * HIDDEN + HIDDEN * HIDDEN + HIDDEN * out_dim) * 2    # bf16 weights
        + (2 * HIDDEN + out_dim) * 4                                    # biases
        + B * out_dim * 4                                               # output
    )

    out = pl.pallas_call(
        _mlp_kernel,
        out_shape=jax.ShapeDtypeStruct((B, out_dim), jnp.float32),
        grid_spec=grid_spec,
        compiler_params=pltpu.CompilerParams(
            dimension_semantics=("parallel",),           # rows are independent
        ),
        cost_estimate=pl.CostEstimate(
            flops=flops, transcendentals=0, bytes_accessed=bytes_accessed),
    )(x, w1, b1, w2, b2, w3, b3)

    return out


def init_params(key, input_dim, output_dim):
    """Init mimicking nn.Linear default (U[-1/sqrt(fan_in), +]).

    Weights stored as (in, out) and cast to bf16 once at init (halves weight
    DMA, native MXU operand dtype on v5e/v6e/v7x); biases kept f32.
    """
    def linear(k, fan_in, fan_out):
        kw, kb = jax.random.split(k)
        bound = 1.0 / jnp.sqrt(jnp.float32(fan_in))
        w = jax.random.uniform(kw, (fan_in, fan_out), jnp.float32, -bound, bound)
        b = jax.random.uniform(kb, (1, fan_out), jnp.float32, -bound, bound)
        return w.astype(jnp.bfloat16), b

    k1, k2, k3 = jax.random.split(key, 3)
    w1, b1 = linear(k1, input_dim, HIDDEN)
    w2, b2 = linear(k2, HIDDEN, HIDDEN)
    w3, b3 = linear(k3, HIDDEN, output_dim)
    return (w1, b1, w2, b2, w3, b3)


def _reference(x, params):
    """Pure-JAX reference using the same bf16 matmul operands as the kernel."""
    w1, b1, w2, b2, w3, b3 = params
    h1 = jnp.maximum(
        jnp.dot(x.astype(jnp.bfloat16), w1, preferred_element_type=jnp.float32) + b1, 0.0)
    h2 = jnp.maximum(
        jnp.dot(h1.astype(jnp.bfloat16), w2, preferred_element_type=jnp.float32) + b2, 0.0)
    return jnp.dot(h2.astype(jnp.bfloat16), w3,
                   preferred_element_type=jnp.float32) + b3


if __name__ == "__main__":
    key = jax.random.PRNGKey(0)
    k_x, k_p = jax.random.split(key)

    # Small but grid-exercising shapes: B=500 -> bm=256, 2 grid steps with a
    # ragged last block (244 valid rows) to exercise the no-pad path.
    batch, input_dim, output_dim = 500, 32, 16
    x = jax.random.normal(k_x, (batch, input_dim), jnp.float32)
    params = init_params(k_p, input_dim, output_dim)

    out = map_predict_forward(x, params)
    jax.block_until_ready(out)

    ref = _reference(x, params)
    assert out.shape == (batch, output_dim)
    assert jnp.allclose(out, ref, atol=1e-3, rtol=1e-3), \
        float(jnp.max(jnp.abs(out - ref)))

    print("KERNEL_OK")
</pallas_src>

<mosaic_0001>
module attributes {stable_mosaic.version = 11 : i64} {
  func.func @_mlp_kernel(%arg0: i32, %arg1: memref<256x32xf32, #tpu.memory_space<vmem>>, %arg2: memref<32x128xbf16, #tpu.memory_space<vmem>>, %arg3: memref<1x128xf32, #tpu.memory_space<vmem>>, %arg4: memref<128x128xbf16, #tpu.memory_space<vmem>>, %arg5: memref<1x128xf32, #tpu.memory_space<vmem>>, %arg6: memref<128x16xbf16, #tpu.memory_space<vmem>>, %arg7: memref<1x16xf32, #tpu.memory_space<vmem>>, %arg8: memref<256x16xf32, #tpu.memory_space<vmem>>) attributes {dimension_semantics = [#tpu.dimension_semantics<parallel>], iteration_bounds = array<i64: 2>, scalar_prefetch = 0 : i64, scratch_operands = 0 : i64, tpu.core_type = #tpu.core_type<tc>, window_params = [{transform_indices = @transform_0, window_bounds = array<i64: 256, 32>}, {pipeline_mode = #tpu.pipeline_mode<synchronous>, transform_indices = @transform_1, window_bounds = array<i64: 32, 128>}, {pipeline_mode = #tpu.pipeline_mode<synchronous>, transform_indices = @transform_2, window_bounds = array<i64: 1, 128>}, {pipeline_mode = #tpu.pipeline_mode<synchronous>, transform_indices = @transform_3, window_bounds = array<i64: 128, 128>}, {pipeline_mode = #tpu.pipeline_mode<synchronous>, transform_indices = @transform_4, window_bounds = array<i64: 1, 128>}, {pipeline_mode = #tpu.pipeline_mode<synchronous>, transform_indices = @transform_5, window_bounds = array<i64: 128, 16>}, {pipeline_mode = #tpu.pipeline_mode<synchronous>, transform_indices = @transform_6, window_bounds = array<i64: 1, 16>}, {transform_indices = @transform_7, window_bounds = array<i64: 256, 16>}]} {
    %c0 = arith.constant 0 : index
    %c0_0 = arith.constant 0 : index
    %0 = vector.load %arg1[%c0, %c0_0] : memref<256x32xf32, #tpu.memory_space<vmem>>, vector<256x32xf32>
    %1 = arith.truncf %0 : vector<256x32xf32> to vector<256x32xbf16>
    %c0_1 = arith.constant 0 : index
    %c0_2 = arith.constant 0 : index
    %2 = vector.load %arg2[%c0_1, %c0_2] : memref<32x128xbf16, #tpu.memory_space<vmem>>, vector<32x128xbf16>
    %cst = arith.constant dense<0.000000e+00> : vector<256x128xf32>
    %3 = tpu.matmul %1, %2, %cst {dimension_numbers = #tpu.dot_dimension_numbers<[1], [0], [0], [1], [0, 0, 1, 1], [], []>} : vector<256x32xbf16>, vector<32x128xbf16>, vector<256x128xf32> -> vector<256x128xf32>
    %c0_3 = arith.constant 0 : index
    %c0_4 = arith.constant 0 : index
    %4 = vector.load %arg3[%c0_3, %c0_4] : memref<1x128xf32, #tpu.memory_space<vmem>>, vector<1x128xf32>
    %5 = vector.broadcast %4 : vector<1x128xf32> to vector<256x128xf32>
    %6 = arith.addf %3, %5 : vector<256x128xf32>
    %cst_5 = arith.constant 0.000000e+00 : f32
    %7 = vector.broadcast %cst_5 : f32 to vector<256x128xf32>
    %8 = arith.maximumf %6, %7 : vector<256x128xf32>
    %9 = arith.truncf %8 : vector<256x128xf32> to vector<256x128xbf16>
    %c0_6 = arith.constant 0 : index
    %c0_7 = arith.constant 0 : index
    %10 = vector.load %arg4[%c0_6, %c0_7] : memref<128x128xbf16, #tpu.memory_space<vmem>>, vector<128x128xbf16>
    %cst_8 = arith.constant dense<0.000000e+00> : vector<256x128xf32>
    %11 = tpu.matmul %9, %10, %cst_8 {dimension_numbers = #tpu.dot_dimension_numbers<[1], [0], [0], [1], [0, 0, 1, 1], [], []>} : vector<256x128xbf16>, vector<128x128xbf16>, vector<256x128xf32> -> vector<256x128xf32>
    %c0_9 = arith.constant 0 : index
    %c0_10 = arith.constant 0 : index
    %12 = vector.load %arg5[%c0_9, %c0_10] : memref<1x128xf32, #tpu.memory_space<vmem>>, vector<1x128xf32>
    %13 = vector.broadcast %12 : vector<1x128xf32> to vector<256x128xf32>
    %14 = arith.addf %11, %13 : vector<256x128xf32>
    %cst_11 = arith.constant 0.000000e+00 : f32
    %15 = vector.broadcast %cst_11 : f32 to vector<256x128xf32>
    %16 = arith.maximumf %14, %15 : vector<256x128xf32>
    %17 = arith.truncf %16 : vector<256x128xf32> to vector<256x128xbf16>
    %c0_12 = arith.constant 0 : index
    %c0_13 = arith.constant 0 : index
    %18 = vector.load %arg6[%c0_12, %c0_13] : memref<128x16xbf16, #tpu.memory_space<vmem>>, vector<128x16xbf16>
    %cst_14 = arith.constant dense<0.000000e+00> : vector<256x16xf32>
    %19 = tpu.matmul %17, %18, %cst_14 {dimension_numbers = #tpu.dot_dimension_numbers<[1], [0], [0], [1], [0, 0, 1, 1], [], []>} : vector<256x128xbf16>, vector<128x16xbf16>, vector<256x16xf32> -> vector<256x16xf32>
    %c0_15 = arith.constant 0 : index
    %c0_16 = arith.constant 0 : index
    %20 = vector.load %arg7[%c0_15, %c0_16] : memref<1x16xf32, #tpu.memory_space<vmem>>, vector<1x16xf32>
    %21 = vector.broadcast %20 : vector<1x16xf32> to vector<256x16xf32>
    %22 = arith.addf %19, %21 : vector<256x16xf32>
    %c0_17 = arith.constant 0 : index
    %c0_18 = arith.constant 0 : index
    %23 = vector.load %arg8[%c0_17, %c0_18] : memref<256x16xf32, #tpu.memory_space<vmem>>, vector<256x16xf32>
    tpu.vector_store %arg8[%c0_17, %c0_18], %22 {strides = array<i32>} : memref<256x16xf32, #tpu.memory_space<vmem>>, vector<256x16xf32>,
    return
  }
  func.func @transform_0(%arg0: i32) -> (i32, i32) {
    %c0_i32 = arith.constant 0 : i32
    %c0_i32_0 = arith.constant 0 : i32
    return %arg0, %c0_i32 : i32, i32
  }
  func.func @transform_1(%arg0: i32) -> (i32, i32) {
    %c0_i32 = arith.constant 0 : i32
    %c0_i32_0 = arith.constant 0 : i32
    %c0_i32_1 = arith.constant 0 : i32
    return %c0_i32, %c0_i32_0 : i32, i32
  }
  func.func @transform_2(%arg0: i32) -> (i32, i32) {
    %c0_i32 = arith.constant 0 : i32
    %c0_i32_0 = arith.constant 0 : i32
    %c0_i32_1 = arith.constant 0 : i32
    return %c0_i32, %c0_i32_0 : i32, i32
  }
  func.func @transform_3(%arg0: i32) -> (i32, i32) {
    %c0_i32 = arith.constant 0 : i32
    %c0_i32_0 = arith.constant 0 : i32
    %c0_i32_1 = arith.constant 0 : i32
    return %c0_i32, %c0_i32_0 : i32, i32
  }
  func.func @transform_4(%arg0: i32) -> (i32, i32) {
    %c0_i32 = arith.constant 0 : i32
    %c0_i32_0 = arith.constant 0 : i32
    %c0_i32_1 = arith.constant 0 : i32
    return %c0_i32, %c0_i32_0 : i32, i32
  }
  func.func @transform_5(%arg0: i32) -> (i32, i32) {
    %c0_i32 = arith.constant 0 : i32
    %c0_i32_0 = arith.constant 0 : i32
    %c0_i32_1 = arith.constant 0 : i32
    return %c0_i32, %c0_i32_0 : i32, i32
  }
  func.func @transform_6(%arg0: i32) -> (i32, i32) {
    %c0_i32 = arith.constant 0 : i32
    %c0_i32_0 = arith.constant 0 : i32
    %c0_i32_1 = arith.constant 0 : i32
    return %c0_i32, %c0_i32_0 : i32, i32
  }
  func.func @transform_7(%arg0: i32) -> (i32, i32) {
    %c0_i32 = arith.constant 0 : i32
    %c0_i32_0 = arith.constant 0 : i32
    return %arg0, %c0_i32 : i32, i32
  }
}

</mosaic_0001>

<bundles_post_ra>
// kernel: map_predict_forward.1
= control target key start
LH: loop header
LB: loop body
LE: loop exit
PB: predicated region body
PF: predicated region fallthrough
CT: control target
= control target key end

     0   :  { %s2014_s24 = smov 0   ;;  %s2016_s25 = smov 0   ;;  %s2478_s0 = inlined_call_operand.vmem [shape: f32[500,32], index: 0, kind: input, shape index: {}]   ;;  %s2479_s1 = inlined_call_operand.vmem [shape: bf16[32,128], index: 1, kind: input, shape index: {}]   ;;  %s2480_s2 = inlined_call_operand.vmem [shape: f32[1,128], index: 2, kind: input, shape index: {}]   ;;  %s2481_s3 = inlined_call_operand.vmem [shape: bf16[128,128], index: 3, kind: input, shape index: {}]   ;;  %s2482_s4 = inlined_call_operand.vmem [shape: f32[1,128], index: 4, kind: input, shape index: {}]   ;;  %s2483_s5 = inlined_call_operand.vmem [shape: bf16[128,16], index: 5, kind: input, shape index: {}]   ;;  %s2484_s6 = inlined_call_operand.vmem [shape: f32[1,16], index: 6, kind: input, shape index: {}]   ;;  %s2485_s7 = inlined_call_operand.vmem [shape: f32[500,16], index: 7, kind: output, shape index: {}]  }
   0x1   :  { %s2018_s26 = smov 0  }
   0x2 LB: > { %s2027_s27 = sadd.s32 4294967295, %s1940_s26   ;;  %s2029_s28 = sadd.s32 1, %s1940_s26   ;;  %s1940_s26 = sphi %s2018_s26, %s2494_s26   ;;  %s1936_s25 = sphi %s2016_s25, %s2493_s25   ;;  %s1932_s24 = sphi %s2014_s24, %s2492_s24  }
   0x3   : > { %s173_s29 = ssub.s32 %s1940_s26, %s2029_s28  ;;  %s176_s30 = sadd.s32 1, %s1936_s25 }
   0x4   : > { %p174_p0 = scmp.eq.s32.totalorder %s173_s29, 0  ;;  %p186_p1 = scmp.ne.s32.totalorder %s1936_s25, %s1932_s24 }
   0x5   : > { %p187_p2 = scmp.eq.s32.totalorder %s2027_s27, 1  ;;  %p1517_p3 = scmp.ge.s32.totalorder %s1940_s26, 1 }
   0x6   : > { %s2037_s8 = scalar_select %p174_p0, %s1936_s25, %s176_s30  }
   0x7   : > { %p2039_p4 = por %p187_p2, %p186_p1  ;;  %p246_p5 = scmp.lt.s32.totalorder %s1940_s26, 3 }
   0x9   : > { %p247_p6 = pnand %p1517_p3, %p246_p5 }
   0xa   : > { %v1868_v0 = vld [vmem:[%s2479_s1] sm:$0xff] (!%p247_p6)   ;;  %s2047_s12 = sshll.u32 (!%p247_p6), %s2027_s27, 5  ;;  %v1869_v1 = vld [vmem:[%s2479_s1 + $0x8] sm:$0xff] (!%p247_p6)   ;;  %vm372_vm0 = vcmask (!%p247_p6), 261120   ;;  %v1872_v29 = vld [vmem:[%s2481_s3 + $0x10] sm:$0xff] (!%p247_p6)   ;;  %s278_s26 = sand.u32 (!%p247_p6), 1, %s1932_s24  }
   0xb   : > { %250 = sbr.rel (%p247_p6) target bundleno = 800 (0x320), region = 48  ;;  %p286_p7 = scmp.lt.s32.totalorder (!%p247_p6), %s2047_s12, 62  ;;  %1644 = vmatprep.subr.bf16.mxu0 (!%p247_p6), %v1868_v0  ;;  %1776 = vmatprep.subr.bf16.mxu1 (!%p247_p6), %v1868_v0  ;;  %v1870_v2 = vld [vmem:[%s2481_s3] sm:$0xff] (!%p247_p6)   ;;  %v1871_v24 = vld [vmem:[%s2481_s3 + $0x8] sm:$0xff] (!%p247_p6)   ;;  %v1873_v38 = vld [vmem:[%s2481_s3 + $0x18] sm:$0xff] (!%p247_p6)   ;;  %vm1142_vm1 = vcmask (!%p247_p6), 130048  }
   0xc   : > { %1645 = vmatpush3.bf16.msra.mxu0 (!%p247_p6), %v1868_v0  ;;  %1778 = vmatpush3.bf16.msra.mxu1 (!%p247_p6), %v1868_v0  ;;  %v1874_v46 = vld [vmem:[%s2481_s3 + $0x20] sm:$0xff] (!%p247_p6)   ;;  %v1875_v51 = vld [vmem:[%s2481_s3 + $0x28] sm:$0xff] (!%p247_p6)   ;;  %v1876_v56 = vld [vmem:[%s2481_s3 + $0x30] sm:$0xff] (!%p247_p6)   ;;  %s1518_s29 = sshll.u32 (!%p247_p6), %s278_s26, 8 }
   0xd   : > { %1646 = vmatprep.subr.bf16.mxu0 (!%p247_p6), %v1869_v1  ;;  %1777 = vmatprep.subr.bf16.mxu1 (!%p247_p6), %v1869_v1  ;;  %v1877_v57 = vld [vmem:[%s2481_s3 + $0x38] sm:$0xff] (!%p247_p6)   ;;  %v1878_v58 = vld [vmem:[%s2483_s5] sm:$0xff] (!%p247_p6)   ;;  %v1879_v59 = vld [vmem:[%s2483_s5 + $0x8] sm:$0xff] (!%p247_p6)   ;;  %s2243_s11 = scalar_lea.vmem (!%p247_p6), [#allocation2], %s1518_s29  }
   0xe   : > { %v1880_v60 = vld [vmem:[%s2483_s5 + $0x10] sm:$0xff] (!%p247_p6)   ;;  %v1881_v61 = vld [vmem:[%s2483_s5 + $0x18] sm:$0xff] (!%p247_p6)   ;;  %v1882_v62 = vld [vmem:[%s2483_s5 + $0x20] sm:$0xff] (!%p247_p6)  }
   0xf   : > { %v1883_v63 = vld [vmem:[%s2483_s5 + $0x28] sm:$0xff] (!%p247_p6)   ;;  %v2152_v0 = vld [vmem:[%s2480_s2] ss:$0 sm:$0xff] (!%p247_p6) }
  0x10   : > { %1647 = vmatpush3.bf16.msra.mxu0 (!%p247_p6), %v1869_v1  ;;  %1779 = vmatpush3.bf16.msra.mxu1 (!%p247_p6), %v1869_v1 }
  0x11   : > { %1680 = vmatprep.subr.bf16.mxu1 (!%p247_p6), %v1870_v2  ;;  %1728 = vmatprep.subr.bf16.mxu0 (!%p247_p6), %v1878_v58 }
  0x12   : > { %s287_s15 = scalar_select %p286_p7, %s2047_s12, 62 }
  0x13   : > { %s1183_s24 = ssub.s32 (%p2039_p4), 63, %s2047_s12  ;;  %s1575_s13 = sshll.u32 (%p2039_p4), %s2027_s27, 8 }
  0x14   : > { %s1520_s18 = sshll.u32 %s287_s15, 3  ;;  %p1184_p8 = scmp.lt.s32.totalorder (%p2039_p4), %s1183_s24, 32 }
  0x15   : > { %s2060_s21 = scalar_lea.vmem %s2478_s0, %s1520_s18  ;;  %s2346_s16 = scalar_lea.vmem (%p2039_p4), %s2485_s7, %s1575_s13  }
  0x16   : > { %v301_v3 = vld [vmem:[%s2060_s21] sm:$0xff]  ;;  %v302_v4 = vld [vmem:[%s2060_s21 + $0x8] sm:$0xff]  ;;  %v303_v5 = vld [vmem:[%s2060_s21 + $0x10] sm:$0xff] }
  0x17   : > { %v333_v6 = vpack.c.bf16 %v302_v4, %v301_v3  ;;  %v304_v7 = vld [vmem:[%s2060_s21 + $0x18] sm:$0xff]  ;;  %v305_v8 = vld [vmem:[%s2060_s21 + $0x20] sm:$0xff]  ;;  %v306_v9 = vld [vmem:[%s2060_s21 + $0x28] sm:$0xff] }
  0x18   : > { %v334_v10 = vpack.c.bf16 %v304_v7, %v303_v5  ;;  %v335_v11 = vpack.c.bf16 %v306_v9, %v305_v8  ;;  %v307_v12 = vld [vmem:[%s2060_s21 + $0x30] sm:$0xff]  ;;  %v308_v13 = vld [vmem:[%s2060_s21 + $0x38] sm:$0xff]  ;;  %v309_v14 = vld [vmem:[%s2060_s21 + $0x40] sm:$0xff] }
  0x19   : > { %1648 = vmatprep.mubr.msk.bf16.mxu0 %vm372_vm0, %v333_v6  ;;  %v310_v15 = vld [vmem:[%s2060_s21 + $0x48] sm:$0xff]  ;;  %v317_v16 = vld [vmem:[%s2060_s21 + $0x80] sm:$0xff]  ;;  %v319_v19 = vld [vmem:[%s2060_s21 + $0x90] sm:$0xff]  ;;  %v336_v25 = vpack.c.bf16 %v308_v13, %v307_v12 }
  0x1a   : > { %1649 = vmatmul.mubr.msk.bf16.vlgmr.msra.gmra.mrb[0].mxu0 %vm372_vm0, %v334_v10  ;;  %v318_v17 = vld [vmem:[%s2060_s21 + $0x88] sm:$0xff]  ;;  %v320_v20 = vld [vmem:[%s2060_s21 + $0x98] sm:$0xff]  ;;  %v321_v21 = vld [vmem:[%s2060_s21 + $0xa0] sm:$0xff]  ;;  %v337_v27 = vpack.c.bf16 %v310_v15, %v309_v14 }
  0x1b   : > { %1652 = vmatprep.mubr.msk.bf16.mxu0 %vm372_vm0, %v335_v11  ;;  %v341_v18 = vpack.c.bf16 %v318_v17, %v317_v16  ;;  %v342_v22 = vpack.c.bf16 %v320_v20, %v319_v19  ;;  %v322_v23 = vld [vmem:[%s2060_s21 + $0xa8] sm:$0xff]  ;;  %v323_v28 = vld [vmem:[%s2060_s21 + $0xb0] sm:$0xff]  ;;  %v324_v30 = vld [vmem:[%s2060_s21 + $0xb8] sm:$0xff]  ;;  %1729 = vmatpush3.bf16.msra.mxu0 %v1878_v58 }
  0x1c   : > { %v343_v26 = vpack.c.bf16 %v322_v23, %v321_v21  ;;  %v325_v31 = vld [vmem:[%s2060_s21 + $0xc0] sm:$0xff]  ;;  %v311_v32 = vld [vmem:[%s2060_s21 + $0x50] sm:$0xff]  ;;  %v312_v33 = vld [vmem:[%s2060_s21 + $0x58] sm:$0xff]  ;;  %v344_v37 = vpack.c.bf16 %v324_v30, %v323_v28  ;;  %1730 = vmatprep.subr.bf16.mxu0 %v1879_v59 }
  0x1d   : > { %1664 = vmatprep.mubr.msk.bf16.mxu1 %vm372_vm0, %v341_v18  ;;  %v326_v34 = vld [vmem:[%s2060_s21 + $0xc8] sm:$0xff]  ;;  %v313_v35 = vld [vmem:[%s2060_s21 + $0x60] sm:$0xff]  ;;  %v338_v40 = vpack.c.bf16 %v312_v33, %v311_v32  ;;  %v327_v42 = vld [vmem:[%s2060_s21 + $0xd0] sm:$0xff] }
  0x1e   : > { %1665 = vmatmul.mubr.msk.bf16.vlgmr.msra.gmra.mrb[0].mxu1 %vm372_vm0, %v342_v22  ;;  %v314_v36 = vld [vmem:[%s2060_s21 + $0x68] sm:$0xff]  ;;  %v345_v39 = vpack.c.bf16 %v326_v34, %v325_v31  ;;  %v328_v43 = vld [vmem:[%s2060_s21 + $0xd8] sm:$0xff]  ;;  %v329_v44 = vld [vmem:[%s2060_s21 + $0xe0] sm:$0xff] }
  0x1f   : > { %1668 = vmatprep.mubr.msk.bf16.mxu1 %vm372_vm0, %v343_v26  ;;  %1681 = vmatpush3.bf16.msra.mxu1 %v1870_v2  ;;  %v339_v41 = vpack.c.bf16 %v314_v36, %v313_v35  ;;  %v330_v45 = vld [vmem:[%s2060_s21 + $0xe8] sm:$0xff]  ;;  %v315_v47 = vld [vmem:[%s2060_s21 + $0x70] sm:$0xff]  ;;  %v316_v48 = vld [vmem:[%s2060_s21 + $0x78] sm:$0xff]  ;;  %v346_v49 = vpack.c.bf16 %v328_v43, %v327_v42 }
  0x20   : > { %1682 = vmatprep.subr.bf16.mxu1 %v1871_v24  ;;  %v347_v50 = vpack.c.bf16 %v330_v45, %v329_v44  ;;  %v340_v52 = vpack.c.bf16 %v316_v48, %v315_v47  ;;  %v331_v53 = vld [vmem:[%s2060_s21 + $0xf0] sm:$0xff]  ;;  %v332_v54 = vld [vmem:[%s2060_s21 + $0xf8] sm:$0xff]  ;;  %1731 = vmatpush3.bf16.msra.mxu0 %v1879_v59 }
  0x21   : > { %v348_v55 = vpack.c.bf16 %v332_v54, %v331_v53  ;;  %1732 = vmatprep.subr.bf16.mxu0 %v1880_v60 }
  0x22   : > { %1653 = vmatmul.mubr.msk.bf16.gmra.mrb[4].mxu0 %vm372_vm0, %v336_v25 }
  0x23   : > { %1656 = vmatprep.mubr.msk.bf16.mxu0 %vm372_vm0, %v337_v27  ;;  %1683 = vmatpush3.bf16.msra.mxu1 %v1871_v24 }
  0x24   : > { %1684 = vmatprep.subr.bf16.mxu1 %v1872_v29  ;;  %1733 = vmatpush3.bf16.msra.mxu0 %v1880_v60 }
  0x25   : > { %1734 = vmatprep.subr.bf16.mxu0 %v1881_v61 }
  0x26   : > { %1669 = vmatmul.mubr.msk.bf16.gmra.mrb[4].mxu1 %vm372_vm0, %v344_v37 }
  0x27   : > { %1672 = vmatprep.mubr.msk.bf16.mxu1 %vm372_vm0, %v345_v39  ;;  %1685 = vmatpush3.bf16.msra.mxu1 %v1872_v29 }
  0x28   : > { %1686 = vmatprep.subr.bf16.mxu1 %v1873_v38  ;;  %1735 = vmatpush3.bf16.msra.mxu0 %v1881_v61 }
  0x29   : > { %1736 = vmatprep.subr.bf16.mxu0 %v1882_v62 }
  0x2a   : > { %1657 = vmatmul.mubr.msk.bf16.gmra.mrb[8].mxu0 %vm372_vm0, %v338_v40 }
  0x2b   : > { %1660 = vmatprep.mubr.msk.bf16.mxu0 %vm372_vm0, %v339_v41  ;;  %1687 = vmatpush3.bf16.msra.mxu1 %v1873_v38 }
  0x2c   : > { %1688 = vmatprep.subr.bf16.mxu1 %v1874_v46  ;;  %1737 = vmatpush3.bf16.msra.mxu0 %v1882_v62 }
  0x2d   : > { %1738 = vmatprep.subr.bf16.mxu0 %v1883_v63 }
  0x2e   : > { %1673 = vmatmul.mubr.msk.bf16.gmra.mrb[8].mxu1 %vm372_vm0, %v346_v49 }
  0x2f   : > { %1676 = vmatprep.mubr.msk.bf16.mxu1 %vm372_vm0, %v347_v50  ;;  %1689 = vmatpush3.bf16.msra.mxu1 %v1874_v46 }
  0x30   : > { %1690 = vmatprep.subr.bf16.mxu1 %v1875_v51  ;;  %1739 = vmatpush3.bf16.msra.mxu0 %v1883_v63 }
  0x32   : > { %1661 = vmatmul.mubr.msk.bf16.gmra.mrb[12].mxu0 %vm372_vm0, %v340_v52 }
  0x33   : > { %1691 = vmatpush3.bf16.msra.mxu1 %v1875_v51 }
  0x34   : > { %1692 = vmatprep.subr.bf16.mxu1 %v1876_v56 }
  0x36   : > { %1677 = vmatmul.mubr.msk.bf16.gmra.mrb[12].mxu1 %vm372_vm0, %v348_v55 }
  0x37   : > { %1693 = vmatpush3.bf16.msra.mxu1 %v1876_v56 }
  0x38   : > { %1694 = vmatprep.subr.bf16.mxu1 %v1877_v57 }
  0x3b   : > { %1695 = vmatpush3.bf16.msra.mxu1 %v1877_v57 }
  0xed   : > { %v1650_v1 = vpop.f32.mrb[0].mxu0 }
  0xee   : > { %v464_v2 = vadd.f32 %v1650_v1, %v2152_v0  ;;  %v455_v3 = vpop.f32.mrb[1].mxu0 }
  0xef   : > { %v456_v4 = vadd.f32 %v2152_v0, %v455_v3  ;;  %v1651_v5 = vpop.f32.mrb[2].mxu0 }
  0xf0   : > { %v467_v6 = vadd.f32 %v1651_v5, %v2152_v0  ;;  %v458_v7 = vpop.f32.mrb[3].mxu0  ;;  %v584_v9 = vmax.f32 %v464_v2, 0.0 }
  0xf1   : > { %v459_v8 = vadd.f32 %v2152_v0, %v458_v7  ;;  %v1666_v11 = vpop.f32.mrb[0].mxu1  ;;  %v582_v12 = vmax.f32 %v456_v4, 0.0 }
  0xf2   : > { %v585_v10 = vmax.f32 %v467_v6, 0.0  ;;  %v528_v14 = vadd.f32 %v1666_v11, %v2152_v0  ;;  %v519_v15 = vpop.f32.mrb[1].mxu1 }
  0xf3   : > { %v583_v13 = vmax.f32 %v459_v8, 0.0  ;;  %v520_v17 = vadd.f32 %v2152_v0, %v519_v15  ;;  %v1667_v18 = vpop.f32.mrb[2].mxu1 }
  0xf4   : > { %v615_v16 = vpack.c.bf16 %v585_v10, %v584_v9  ;;  %v600_v21 = vmax.f32 %v528_v14, 0.0  ;;  %v531_v22 = vadd.f32 %v1667_v18, %v2152_v0  ;;  %v522_v23 = vpop.f32.mrb[3].mxu1 }
  0xf5   : > { %v614_v19 = vpack.c.bf16 %v583_v13, %v582_v12  ;;  %v1654_v20 = vpop.f32.mrb[4].mxu0  ;;  %v598_v26 = vmax.f32 %v520_v17, 0.0  ;;  %v523_v27 = vadd.f32 %v2152_v0, %v522_v23 }
  0xf6   : > { %v480_v24 = vadd.f32 %v1654_v20, %v2152_v0  ;;  %v471_v25 = vpop.f32.mrb[5].mxu0  ;;  %v601_v30 = vmax.f32 %v531_v22, 0.0 }
  0xf7   : > { %v472_v28 = vadd.f32 %v2152_v0, %v471_v25  ;;  %v1655_v29 = vpop.f32.mrb[6].mxu0  ;;  %1696 = vmatprep.mubr.bf16.mxu1 %v614_v19  ;;  %v599_v33 = vmax.f32 %v523_v27, 0.0 }
  0xf8   : > { %v483_v31 = vadd.f32 %v1655_v29, %v2152_v0  ;;  %v474_v32 = vpop.f32.mrb[7].mxu0  ;;  %1697 = vmatmul.mubr.bf16.vlgmr.msra.gmra.mrb[16].mxu1 %v615_v16  ;;  %v2166_v35 = vpack.c.bf16 %v601_v30, %v600_v21  ;;  %v588_v36 = vmax.f32 %v480_v24, 0.0 }
  0xf9   : > { %v475_v34 = vadd.f32 %v2152_v0, %v474_v32  ;;  %v2168_v38 = vpack.c.bf16 %v599_v33, %v598_v26  ;;  %v1670_v39 = vpop.f32.mrb[4].mxu1  ;;  %v586_v40 = vmax.f32 %v472_v28, 0.0 }
  0xfa   : > { %v589_v37 = vmax.f32 %v483_v31, 0.0  ;;  %v544_v42 = vadd.f32 %v1670_v39, %v2152_v0  ;;  %v535_v43 = vpop.f32.mrb[5].mxu1 }
  0xfb   : > { %v587_v41 = vmax.f32 %v475_v34, 0.0  ;;  %v536_v45 = vadd.f32 %v2152_v0, %v535_v43  ;;  %v1671_v46 = vpop.f32.mrb[6].mxu1 }
  0xfc   : > { %v617_v44 = vpack.c.bf16 %v589_v37, %v588_v36  ;;  %v604_v49 = vmax.f32 %v544_v42, 0.0  ;;  %v547_v50 = vadd.f32 %v1671_v46, %v2152_v0  ;;  %v538_v51 = vpop.f32.mrb[7].mxu1 }
  0xfd   : > { %v616_v47 = vpack.c.bf16 %v587_v41, %v586_v40  ;;  %v1658_v48 = vpop.f32.mrb[8].mxu0  ;;  %v602_v54 = vmax.f32 %v536_v45, 0.0  ;;  %v539_v55 = vadd.f32 %v2152_v0, %v538_v51 }
  0xfe   : > { %v496_v52 = vadd.f32 %v1658_v48, %v2152_v0  ;;  %v487_v53 = vpop.f32.mrb[9].mxu0  ;;  %v605_v58 = vmax.f32 %v547_v50, 0.0 }
  0xff   : > { %v488_v56 = vadd.f32 %v2152_v0, %v487_v53  ;;  %v1659_v57 = vpop.f32.mrb[10].mxu0  ;;  %1700 = vmatprep.mubr.bf16.mxu1 %v616_v47  ;;  %v603_v61 = vmax.f32 %v539_v55, 0.0 }
 0x100   : > { %v499_v59 = vadd.f32 %v1659_v57, %v2152_v0  ;;  %v490_v60 = vpop.f32.mrb[11].mxu0  ;;  %1701 = vmatmul.mubr.bf16.gmra.mrb[20].mxu1 %v617_v44  ;;  %v625_v63 = vpack.c.bf16 %v605_v58, %v604_v49  ;;  %v592_v1 = vmax.f32 %v496_v52, 0.0 }
 0x101   : > { %v491_v62 = vadd.f32 %v2152_v0, %v490_v60  ;;  %v624_v3 = vpack.c.bf16 %v603_v61, %v602_v54  ;;  %v1674_v4 = vpop.f32.mrb[8].mxu1  ;;  %v590_v5 = vmax.f32 %v488_v56, 0.0 }
 0x102   : > { %v593_v2 = vmax.f32 %v499_v59, 0.0  ;;  %v560_v7 = vadd.f32 %v1674_v4, %v2152_v0  ;;  %v551_v8 = vpop.f32.mrb[9].mxu1 }
 0x103   : > { %v591_v6 = vmax.f32 %v491_v62, 0.0  ;;  %v552_v10 = vadd.f32 %v2152_v0, %v551_v8  ;;  %v1675_v11 = vpop.f32.mrb[10].mxu1 }
 0x104   : > { %v619_v9 = vpack.c.bf16 %v593_v2, %v592_v1  ;;  %v608_v14 = vmax.f32 %v560_v7, 0.0  ;;  %v563_v15 = vadd.f32 %v1675_v11, %v2152_v0  ;;  %v554_v16 = vpop.f32.mrb[11].mxu1 }
 0x105   : > { %v618_v12 = vpack.c.bf16 %v591_v6, %v590_v5  ;;  %v1662_v13 = vpop.f32.mrb[12].mxu0  ;;  %v606_v19 = vmax.f32 %v552_v10, 0.0  ;;  %v555_v20 = vadd.f32 %v2152_v0, %v554_v16 }
 0x106   : > { %v512_v17 = vadd.f32 %v1662_v13, %v2152_v0  ;;  %v503_v18 = vpop.f32.mrb[13].mxu0  ;;  %v609_v23 = vmax.f32 %v563_v15, 0.0 }
 0x107   : > { %v504_v21 = vadd.f32 %v2152_v0, %v503_v18  ;;  %v1663_v22 = vpop.f32.mrb[14].mxu0  ;;  %1704 = vmatprep.mubr.bf16.mxu1 %v618_v12  ;;  %v607_v26 = vmax.f32 %v555_v20, 0.0 }
 0x108   : > { %v515_v24 = vadd.f32 %v1663_v22, %v2152_v0  ;;  %v506_v25 = vpop.f32.mrb[15].mxu0  ;;  %1705 = vmatmul.mubr.bf16.gmra.mrb[24].mxu1 %v619_v9  ;;  %v627_v28 = vpack.c.bf16 %v609_v23, %v608_v14  ;;  %v596_v29 = vmax.f32 %v512_v17, 0.0 }
 0x109   : > { %v507_v27 = vadd.f32 %v2152_v0, %v506_v25  ;;  %v626_v31 = vpack.c.bf16 %v607_v26, %v606_v19  ;;  %v1678_v32 = vpop.f32.mrb[12].mxu1  ;;  %v594_v33 = vmax.f32 %v504_v21, 0.0 }
 0x10a   : > { %v597_v30 = vmax.f32 %v515_v24, 0.0  ;;  %v576_v36 = vadd.f32 %v1678_v32, %v2152_v0  ;;  %v567_v37 = vpop.f32.mrb[13].mxu1 }
 0x10b   : > { %v595_v34 = vmax.f32 %v507_v27, 0.0  ;;  %v568_v40 = vadd.f32 %v2152_v0, %v567_v37  ;;  %v1679_v41 = vpop.f32.mrb[14].mxu1 }
 0x10c   : > { %v621_v39 = vpack.c.bf16 %v597_v30, %v596_v29  ;;  %v612_v43 = vmax.f32 %v576_v36, 0.0  ;;  %v579_v44 = vadd.f32 %v1679_v41, %v2152_v0  ;;  %v570_v45 = vpop.f32.mrb[15].mxu1 }
 0x10d   : > { %v620_v42 = vpack.c.bf16 %v595_v34, %v594_v33  ;;  %v610_v46 = vmax.f32 %v568_v40, 0.0  ;;  %v571_v47 = vadd.f32 %v2152_v0, %v570_v45  ;;  %v1884_v0 = vld [vmem:[%s2483_s5 + $0x30] sm:$0xff]  }
 0x10e   : > { %v613_v48 = vmax.f32 %v579_v44, 0.0  ;;  %1740 = vmatprep.subr.bf16.mxu0 %v1884_v0 }
 0x10f   : > { %1708 = vmatprep.mubr.bf16.mxu1 %v620_v42  ;;  %v611_v49 = vmax.f32 %v571_v47, 0.0  ;;  %1741 = vmatpush3.bf16.msra.mxu0 %v1884_v0 }
 0x110   : > { %1709 = vmatmul.mubr.bf16.gmra.mrb[28].mxu1 %v621_v39  ;;  %v629_v50 = vpack.c.bf16 %v613_v48, %v612_v43 }
 0x111   : > { %1712 = vmatprep.mubr.bf16.mxu1 %v2168_v38  ;;  %v628_v51 = vpack.c.bf16 %v611_v49, %v610_v46  ;;  %v1885_v38 = vld [vmem:[%s2483_s5 + $0x38] sm:$0xff]  }
 0x112   : > { %1742 = vmatprep.subr.bf16.mxu0 %v1885_v38 }
 0x113   : > { %1743 = vmatpush3.bf16.msra.mxu0 %v1885_v38 }
 0x118   : > { %1713 = vmatmul.mubr.bf16.gmra.mrb[32].mxu1 %v2166_v35  ;;  %v2201_v35 = vld [vmem:[%s2482_s4] ss:$0 sm:$0xff] }
 0x119   : > { %1716 = vmatprep.mubr.bf16.mxu1 %v624_v3 }
 0x120   : > { %1717 = vmatmul.mubr.bf16.gmra.mrb[36].mxu1 %v625_v63 }
 0x121   : > { %1720 = vmatprep.mubr.bf16.mxu1 %v626_v31 }
 0x128   : > { %1721 = vmatmul.mubr.bf16.gmra.mrb[40].mxu1 %v627_v28 }
 0x129   : > { %1724 = vmatprep.mubr.bf16.mxu1 %v628_v51 }
 0x130   : > { %1725 = vmatmul.mubr.bf16.gmra.mrb[44].mxu1 %v629_v50 }
 0x1cb   : > { %v1698_v52 = vpop.f32.mrb[16].mxu1 }
 0x1cc   : > { %v744_v53 = vadd.f32 %v1698_v52, %v2201_v35  ;;  %v735_v54 = vpop.f32.mrb[17].mxu1 }
 0x1cd   : > { %v736_v55 = vadd.f32 %v2201_v35, %v735_v54  ;;  %v1699_v56 = vpop.f32.mrb[18].mxu1 }
 0x1ce   : > { %v747_v57 = vadd.f32 %v1699_v56, %v2201_v35  ;;  %v738_v58 = vpop.f32.mrb[19].mxu1  ;;  %v864_v60 = vmax.f32 %v744_v53, 0.0 }
 0x1cf   : > { %v739_v59 = vadd.f32 %v2201_v35, %v738_v58  ;;  %v862_v62 = vmax.f32 %v736_v55, 0.0 }
 0x1d0   : > { %v865_v61 = vmax.f32 %v747_v57, 0.0 }
 0x1d1   : > { %v863_v63 = vmax.f32 %v739_v59, 0.0 }
 0x1d2   : > { %v895_v1 = vpack.c.bf16 %v865_v61, %v864_v60 }
 0x1d3   : > { %v894_v2 = vpack.c.bf16 %v863_v63, %v862_v62  ;;  %v1702_v3 = vpop.f32.mrb[20].mxu1 }
 0x1d4   : > { %v760_v4 = vadd.f32 %v1702_v3, %v2201_v35  ;;  %v751_v5 = vpop.f32.mrb[21].mxu1 }
 0x1d5   : > { %v752_v6 = vadd.f32 %v2201_v35, %v751_v5  ;;  %v1703_v7 = vpop.f32.mrb[22].mxu1  ;;  %1744 = vmatprep.mubr.bf16.mxu0 %v894_v2 }
 0x1d6   : > { %v763_v8 = vadd.f32 %v1703_v7, %v2201_v35  ;;  %v754_v9 = vpop.f32.mrb[23].mxu1  ;;  %1745 = vmatmul.mubr.bf16.vlgmr.msra.gmra.mrb[16].mxu0 %v895_v1  ;;  %v868_v11 = vmax.f32 %v760_v4, 0.0 }
 0x1d7   : > { %v755_v10 = vadd.f32 %v2201_v35, %v754_v9  ;;  %v866_v13 = vmax.f32 %v752_v6, 0.0 }
 0x1d8   : > { %v869_v12 = vmax.f32 %v763_v8, 0.0 }
 0x1d9   : > { %v867_v14 = vmax.f32 %v755_v10, 0.0 }
 0x1da   : > { %v897_v15 = vpack.c.bf16 %v869_v12, %v868_v11 }
 0x1db   : > { %v896_v16 = vpack.c.bf16 %v867_v14, %v866_v13  ;;  %v1706_v17 = vpop.f32.mrb[24].mxu1 }
 0x1dc   : > { %v776_v18 = vadd.f32 %v1706_v17, %v2201_v35  ;;  %v767_v19 = vpop.f32.mrb[25].mxu1 }
 0x1dd   : > { %v768_v20 = vadd.f32 %v2201_v35, %v767_v19  ;;  %v1707_v21 = vpop.f32.mrb[26].mxu1  ;;  %1748 = vmatprep.mubr.bf16.mxu0 %v896_v16 }
 0x1de   : > { %v779_v22 = vadd.f32 %v1707_v21, %v2201_v35  ;;  %v770_v23 = vpop.f32.mrb[27].mxu1  ;;  %1749 = vmatmul.mubr.bf16.gmra.mrb[20].mxu0 %v897_v15  ;;  %v872_v25 = vmax.f32 %v776_v18, 0.0 }
 0x1df   : > { %v771_v24 = vadd.f32 %v2201_v35, %v770_v23  ;;  %v870_v27 = vmax.f32 %v768_v20, 0.0 }
 0x1e0   : > { %v873_v26 = vmax.f32 %v779_v22, 0.0 }
 0x1e1   : > { %v871_v28 = vmax.f32 %v771_v24, 0.0 }
 0x1e2   : > { %v899_v29 = vpack.c.bf16 %v873_v26, %v872_v25 }
 0x1e3   : > { %v898_v30 = vpack.c.bf16 %v871_v28, %v870_v27  ;;  %v1710_v31 = vpop.f32.mrb[28].mxu1 }
 0x1e4   : > { %v792_v32 = vadd.f32 %v1710_v31, %v2201_v35  ;;  %v783_v33 = vpop.f32.mrb[29].mxu1 }
 0x1e5   : > { %v784_v34 = vadd.f32 %v2201_v35, %v783_v33  ;;  %v1711_v36 = vpop.f32.mrb[30].mxu1  ;;  %1752 = vmatprep.mubr.bf16.mxu0 %v898_v30 }
 0x1e6   : > { %v795_v37 = vadd.f32 %v1711_v36, %v2201_v35  ;;  %v786_v39 = vpop.f32.mrb[31].mxu1  ;;  %1753 = vmatmul.mubr.bf16.gmra.mrb[24].mxu0 %v899_v29  ;;  %v876_v41 = vmax.f32 %v792_v32, 0.0 }
 0x1e7   : > { %v787_v40 = vadd.f32 %v2201_v35, %v786_v39  ;;  %v874_v43 = vmax.f32 %v784_v34, 0.0 }
 0x1e8   : > { %v877_v42 = vmax.f32 %v795_v37, 0.0 }
 0x1e9   : > { %v875_v44 = vmax.f32 %v787_v40, 0.0  ;;  %v2239_v40 = vld [vmem:[%s2484_s6] ss:$0 sm:$0xff] }
 0x1ea   : > { %v901_v45 = vpack.c.bf16 %v877_v42, %v876_v41 }
 0x1eb   : > { %v900_v46 = vpack.c.bf16 %v875_v44, %v874_v43  ;;  %v1714_v47 = vpop.f32.mrb[32].mxu1 }
 0x1ec   : > { %v808_v48 = vadd.f32 %v1714_v47, %v2201_v35  ;;  %v799_v49 = vpop.f32.mrb[33].mxu1 }
 0x1ed   : > { %v800_v50 = vadd.f32 %v2201_v35, %v799_v49  ;;  %v1715_v51 = vpop.f32.mrb[34].mxu1  ;;  %1756 = vmatprep.mubr.bf16.mxu0 %v900_v46 }
 0x1ee   : > { %v811_v0 = vadd.f32 %v1715_v51, %v2201_v35  ;;  %v802_v38 = vpop.f32.mrb[35].mxu1  ;;  %1757 = vmatmul.mubr.bf16.gmra.mrb[28].mxu0 %v901_v45  ;;  %v880_v53 = vmax.f32 %v808_v48, 0.0 }
 0x1ef   : > { %v803_v52 = vadd.f32 %v2201_v35, %v802_v38  ;;  %v878_v55 = vmax.f32 %v800_v50, 0.0 }
 0x1f0   : > { %v881_v54 = vmax.f32 %v811_v0, 0.0 }
 0x1f1   : > { %v879_v56 = vmax.f32 %v803_v52, 0.0 }
 0x1f2   : > { %v903_v57 = vpack.c.bf16 %v881_v54, %v880_v53 }
 0x1f3   : > { %v902_v58 = vpack.c.bf16 %v879_v56, %v878_v55  ;;  %v1718_v59 = vpop.f32.mrb[36].mxu1 }
 0x1f4   : > { %v824_v60 = vadd.f32 %v1718_v59, %v2201_v35  ;;  %v815_v61 = vpop.f32.mrb[37].mxu1 }
 0x1f5   : > { %v816_v62 = vadd.f32 %v2201_v35, %v815_v61  ;;  %v1719_v63 = vpop.f32.mrb[38].mxu1  ;;  %1760 = vmatprep.mubr.bf16.mxu0 %v902_v58 }
 0x1f6   : > { %v827_v1 = vadd.f32 %v1719_v63, %v2201_v35  ;;  %v818_v2 = vpop.f32.mrb[39].mxu1  ;;  %1761 = vmatmul.mubr.bf16.gmra.mrb[32].mxu0 %v903_v57  ;;  %v884_v4 = vmax.f32 %v824_v60, 0.0 }
 0x1f7   : > { %v819_v3 = vadd.f32 %v2201_v35, %v818_v2  ;;  %v882_v6 = vmax.f32 %v816_v62, 0.0 }
 0x1f8   : > { %v885_v5 = vmax.f32 %v827_v1, 0.0 }
 0x1f9   : > { %v883_v7 = vmax.f32 %v819_v3, 0.0 }
 0x1fa   : > { %v905_v8 = vpack.c.bf16 %v885_v5, %v884_v4 }
 0x1fb   : > { %v904_v9 = vpack.c.bf16 %v883_v7, %v882_v6  ;;  %v1722_v10 = vpop.f32.mrb[40].mxu1 }
 0x1fc   : > { %v840_v11 = vadd.f32 %v1722_v10, %v2201_v35  ;;  %v831_v12 = vpop.f32.mrb[41].mxu1 }
 0x1fd   : > { %v832_v13 = vadd.f32 %v2201_v35, %v831_v12  ;;  %v1723_v14 = vpop.f32.mrb[42].mxu1  ;;  %1764 = vmatprep.mubr.bf16.mxu0 %v904_v9 }
 0x1fe   : > { %v843_v15 = vadd.f32 %v1723_v14, %v2201_v35  ;;  %v834_v16 = vpop.f32.mrb[43].mxu1  ;;  %1765 = vmatmul.mubr.bf16.gmra.mrb[36].mxu0 %v905_v8  ;;  %v888_v18 = vmax.f32 %v840_v11, 0.0 }
 0x1ff   : > { %v835_v17 = vadd.f32 %v2201_v35, %v834_v16  ;;  %v886_v20 = vmax.f32 %v832_v13, 0.0 }
 0x200   : > { %v889_v19 = vmax.f32 %v843_v15, 0.0 }
 0x201   : > { %v887_v21 = vmax.f32 %v835_v17, 0.0 }
 0x202   : > { %v907_v22 = vpack.c.bf16 %v889_v19, %v888_v18 }
 0x203   : > { %v906_v23 = vpack.c.bf16 %v887_v21, %v886_v20  ;;  %v1726_v24 = vpop.f32.mrb[44].mxu1 }
 0x204   : > { %v856_v25 = vadd.f32 %v1726_v24, %v2201_v35  ;;  %v847_v26 = vpop.f32.mrb[45].mxu1 }
 0x205   : > { %v848_v27 = vadd.f32 %v2201_v35, %v847_v26  ;;  %v1727_v28 = vpop.f32.mrb[46].mxu1  ;;  %1768 = vmatprep.mubr.bf16.mxu0 %v906_v23 }
 0x206   : > { %v859_v29 = vadd.f32 %v1727_v28, %v2201_v35  ;;  %v850_v30 = vpop.f32.mrb[47].mxu1  ;;  %1769 = vmatmul.mubr.bf16.gmra.mrb[40].mxu0 %v907_v22  ;;  %v892_v32 = vmax.f32 %v856_v25, 0.0 }
 0x207   : > { %v851_v31 = vadd.f32 %v2201_v35, %v850_v30  ;;  %v890_v34 = vmax.f32 %v848_v27, 0.0 }
 0x208   : > { %v893_v33 = vmax.f32 %v859_v29, 0.0 }
 0x209   : > { %v891_v36 = vmax.f32 %v851_v31, 0.0 }
 0x20a   : > { %v909_v37 = vpack.c.bf16 %v893_v33, %v892_v32 }
 0x20b   : > { %v908_v39 = vpack.c.bf16 %v891_v36, %v890_v34 }
 0x20d   : > { %1772 = vmatprep.mubr.bf16.mxu0 %v908_v39 }
 0x20e   : > { %1773 = vmatmul.mubr.bf16.gmra.mrb[44].mxu0 %v909_v37 }
 0x2a9   : > { %v1746_v41 = vpop.f32.mrb[16].mxu0 }
 0x2aa   : > { %v1024_v42 = vadd.f32 %v1746_v41, %v2239_v40  ;;  %v1015_v35 = vpop.f32.mrb[17].mxu0 }
 0x2ab   : > { %v1016_v43 = vadd.f32 %v2239_v40, %v1015_v35  ;;  %v1747_v44 = vpop.f32.mrb[18].mxu0 }
 0x2ac   : > { %1145 = vst.msk [vmem:[%s2243_s11 + $0x10] sm:$0xff] %vm1142_vm1, %v1024_v42  ;;  %v1027_v45 = vadd.f32 %v1747_v44, %v2239_v40  ;;  %v1018_v46 = vpop.f32.mrb[19].mxu0 }
 0x2ad   : > { %1143 = vst.msk [vmem:[%s2243_s11] sm:$0xff] %vm1142_vm1, %v1016_v43  ;;  %v1019_v47 = vadd.f32 %v2239_v40, %v1018_v46 }
 0x2ae   : > { %1146 = vst.msk [vmem:[%s2243_s11 + $0x18] sm:$0xff] %vm1142_vm1, %v1027_v45 }
 0x2af   : > { %1144 = vst.msk [vmem:[%s2243_s11 + $0x8] sm:$0xff] %vm1142_vm1, %v1019_v47 }
 0x2b1   : > { %v1750_v48 = vpop.f32.mrb[20].mxu0 }
 0x2b2   : > { %v1040_v49 = vadd.f32 %v1750_v48, %v2239_v40  ;;  %v1031_v50 = vpop.f32.mrb[21].mxu0 }
 0x2b3   : > { %v1032_v51 = vadd.f32 %v2239_v40, %v1031_v50  ;;  %v1751_v0 = vpop.f32.mrb[22].mxu0 }
 0x2b4   : > { %1149 = vst.msk [vmem:[%s2243_s11 + $0x30] sm:$0xff] %vm1142_vm1, %v1040_v49  ;;  %v1043_v38 = vadd.f32 %v1751_v0, %v2239_v40  ;;  %v1034_v52 = vpop.f32.mrb[23].mxu0 }
 0x2b5   : > { %1147 = vst.msk [vmem:[%s2243_s11 + $0x20] sm:$0xff] %vm1142_vm1, %v1032_v51  ;;  %v1035_v53 = vadd.f32 %v2239_v40, %v1034_v52 }
 0x2b6   : > { %1150 = vst.msk [vmem:[%s2243_s11 + $0x38] sm:$0xff] %vm1142_vm1, %v1043_v38 }
 0x2b7   : > { %1148 = vst.msk [vmem:[%s2243_s11 + $0x28] sm:$0xff] %vm1142_vm1, %v1035_v53 }
 0x2b9   : > { %v1754_v54 = vpop.f32.mrb[24].mxu0 }
 0x2ba   : > { %v1056_v55 = vadd.f32 %v1754_v54, %v2239_v40  ;;  %v1047_v56 = vpop.f32.mrb[25].mxu0 }
 0x2bb   : > { %v1048_v57 = vadd.f32 %v2239_v40, %v1047_v56  ;;  %v1755_v58 = vpop.f32.mrb[26].mxu0 }
 0x2bc   : > { %1153 = vst.msk [vmem:[%s2243_s11 + $0x50] sm:$0xff] %vm1142_vm1, %v1056_v55  ;;  %v1059_v59 = vadd.f32 %v1755_v58, %v2239_v40  ;;  %v1050_v60 = vpop.f32.mrb[27].mxu0 }
 0x2bd   : > { %1151 = vst.msk [vmem:[%s2243_s11 + $0x40] sm:$0xff] %vm1142_vm1, %v1048_v57  ;;  %v1051_v61 = vadd.f32 %v2239_v40, %v1050_v60 }
 0x2be   : > { %1154 = vst.msk [vmem:[%s2243_s11 + $0x58] sm:$0xff] %vm1142_vm1, %v1059_v59 }
 0x2bf   : > { %1152 = vst.msk [vmem:[%s2243_s11 + $0x48] sm:$0xff] %vm1142_vm1, %v1051_v61 }
 0x2c1   : > { %v1758_v62 = vpop.f32.mrb[28].mxu0 }
 0x2c2   : > { %v1072_v63 = vadd.f32 %v1758_v62, %v2239_v40  ;;  %v1063_v1 = vpop.f32.mrb[29].mxu0 }
 0x2c3   : > { %v1064_v2 = vadd.f32 %v2239_v40, %v1063_v1  ;;  %v1759_v3 = vpop.f32.mrb[30].mxu0 }
 0x2c4   : > { %1157 = vst.msk [vmem:[%s2243_s11 + $0x70] sm:$0xff] %vm1142_vm1, %v1072_v63  ;;  %v1075_v4 = vadd.f32 %v1759_v3, %v2239_v40  ;;  %v1066_v5 = vpop.f32.mrb[31].mxu0 }
 0x2c5   : > { %1155 = vst.msk [vmem:[%s2243_s11 + $0x60] sm:$0xff] %vm1142_vm1, %v1064_v2  ;;  %v1067_v6 = vadd.f32 %v2239_v40, %v1066_v5 }
 0x2c6   : > { %1158 = vst.msk [vmem:[%s2243_s11 + $0x78] sm:$0xff] %vm1142_vm1, %v1075_v4 }
 0x2c7   : > { %1156 = vst.msk [vmem:[%s2243_s11 + $0x68] sm:$0xff] %vm1142_vm1, %v1067_v6 }
 0x2c9   : > { %v1762_v7 = vpop.f32.mrb[32].mxu0 }
 0x2ca   : > { %v1088_v8 = vadd.f32 %v1762_v7, %v2239_v40  ;;  %v1079_v9 = vpop.f32.mrb[33].mxu0 }
 0x2cb   : > { %v1080_v10 = vadd.f32 %v2239_v40, %v1079_v9  ;;  %v1763_v11 = vpop.f32.mrb[34].mxu0 }
 0x2cc   : > { %1161 = vst.msk [vmem:[%s2243_s11 + $0x90] sm:$0xff] %vm1142_vm1, %v1088_v8  ;;  %v1091_v12 = vadd.f32 %v1763_v11, %v2239_v40  ;;  %v1082_v13 = vpop.f32.mrb[35].mxu0 }
 0x2cd   : > { %1159 = vst.msk [vmem:[%s2243_s11 + $0x80] sm:$0xff] %vm1142_vm1, %v1080_v10  ;;  %v1083_v14 = vadd.f32 %v2239_v40, %v1082_v13 }
 0x2ce   : > { %1162 = vst.msk [vmem:[%s2243_s11 + $0x98] sm:$0xff] %vm1142_vm1, %v1091_v12 }
 0x2cf   : > { %1160 = vst.msk [vmem:[%s2243_s11 + $0x88] sm:$0xff] %vm1142_vm1, %v1083_v14 }
 0x2d1   : > { %v1766_v15 = vpop.f32.mrb[36].mxu0 }
 0x2d2   : > { %v1104_v16 = vadd.f32 %v1766_v15, %v2239_v40  ;;  %v1095_v17 = vpop.f32.mrb[37].mxu0 }
 0x2d3   : > { %v1096_v18 = vadd.f32 %v2239_v40, %v1095_v17  ;;  %v1767_v19 = vpop.f32.mrb[38].mxu0 }
 0x2d4   : > { %1165 = vst.msk [vmem:[%s2243_s11 + $0xb0] sm:$0xff] %vm1142_vm1, %v1104_v16  ;;  %v1107_v20 = vadd.f32 %v1767_v19, %v2239_v40  ;;  %v1098_v21 = vpop.f32.mrb[39].mxu0 }
 0x2d5   : > { %1163 = vst.msk [vmem:[%s2243_s11 + $0xa0] sm:$0xff] %vm1142_vm1, %v1096_v18  ;;  %v1099_v22 = vadd.f32 %v2239_v40, %v1098_v21 }
 0x2d6   : > { %1166 = vst.msk [vmem:[%s2243_s11 + $0xb8] sm:$0xff] %vm1142_vm1, %v1107_v20 }
 0x2d7   : > { %1164 = vst.msk [vmem:[%s2243_s11 + $0xa8] sm:$0xff] %vm1142_vm1, %v1099_v22 }
 0x2d9   : > { %v1770_v23 = vpop.f32.mrb[40].mxu0 }
 0x2da   : > { %v1120_v24 = vadd.f32 %v1770_v23, %v2239_v40  ;;  %v1111_v25 = vpop.f32.mrb[41].mxu0 }
 0x2db   : > { %v1112_v26 = vadd.f32 %v2239_v40, %v1111_v25  ;;  %v1771_v27 = vpop.f32.mrb[42].mxu0 }
 0x2dc   : > { %1169 = vst.msk [vmem:[%s2243_s11 + $0xd0] sm:$0xff] %vm1142_vm1, %v1120_v24  ;;  %v1123_v28 = vadd.f32 %v1771_v27, %v2239_v40  ;;  %v1114_v29 = vpop.f32.mrb[43].mxu0 }
 0x2dd   : > { %1167 = vst.msk [vmem:[%s2243_s11 + $0xc0] sm:$0xff] %vm1142_vm1, %v1112_v26  ;;  %v1115_v30 = vadd.f32 %v2239_v40, %v1114_v29 }
 0x2de   : > { %1170 = vst.msk [vmem:[%s2243_s11 + $0xd8] sm:$0xff] %vm1142_vm1, %v1123_v28 }
 0x2df   : > { %1168 = vst.msk [vmem:[%s2243_s11 + $0xc8] sm:$0xff] %vm1142_vm1, %v1115_v30 }
 0x2e1   : > { %v1774_v31 = vpop.f32.mrb[44].mxu0  ;;  %1181 = sbr.rel (!%p2039_p4) target bundleno = 800 (0x320), region = 52 }
 0x2e2   : > { %v1136_v32 = vadd.f32 %v1774_v31, %v2239_v40  ;;  %v1127_v33 = vpop.f32.mrb[45].mxu0 }
 0x2e3   : > { %v1128_v34 = vadd.f32 %v2239_v40, %v1127_v33  ;;  %v1775_v36 = vpop.f32.mrb[46].mxu0 }
 0x2e4   : > { %1173 = vst.msk [vmem:[%s2243_s11 + $0xf0] sm:$0xff] %vm1142_vm1, %v1136_v32  ;;  %v1139_v37 = vadd.f32 %v1775_v36, %v2239_v40  ;;  %v1130_v39 = vpop.f32.mrb[47].mxu0 }
 0x2e5   : > { %1171 = vst.msk [vmem:[%s2243_s11 + $0xe0] sm:$0xff] %vm1142_vm1, %v1128_v34  ;;  %v1131_v41 = vadd.f32 %v2239_v40, %v1130_v39 }
 0x2e6   : > { %1174 = vst.msk [vmem:[%s2243_s11 + $0xf8] sm:$0xff] %vm1142_vm1, %v1139_v37 }
 0x2e7   : > { %1172 = vst.msk [vmem:[%s2243_s11 + $0xe8] sm:$0xff] %vm1142_vm1, %v1131_v41 }
 0x2e8   : > { %s2496_s24 = smov (!%p1184_p8, %s1183_s24), 32 }
 0x2e9   : > { %s1560_s17 = sshll.u32 %s2496_s24, 7 }
 0x2ea   : > { %p1563_p9 = scmp.eq.s32.totalorder %s1560_s17, 0 }
 0x2eb   : > { %s2352_s18 = sshrl.u32 (!%p1563_p9), %s2496_s24, 5 }
 0x2ec   : > { %1192 = sbr.rel (%p1563_p9) target bundleno = 800 (0x320), region = 56  ;;  %p1564_p10 = scmp.le.s32.totalorder (!%p1563_p9), %s2352_s18, 0 }
 0x2f3   : > { %1470 = sbr.rel (%p1564_p10) target bundleno = 779 (0x30b), region = 132  ;;  %s2487_s27 = smov (!%p1564_p10), %s2346_s16 }
 0x2f4   : > { %s2488_s9 = smov (!%p1564_p10), %s2243_s11  ;;  %s2361_s12 = smov (!%p1564_p10), 0  }
 0x2f5   : > { %s2363_s19 = smov (!%p1564_p10), 0  }
 0x2fa LB: >> { %v1316_v40 = vld [vmem:[%s1948_s9] sm:$0xff]  ;;  %v1318_v42 = vld [vmem:[%s1948_s9 + $0x8] sm:$0xff]  ;;  %v1320_v35 = vld [vmem:[%s1948_s9 + $0x10] sm:$0xff]  ;;  %s1380_s20 = sadd.s32 1, %s1952_s12  ;;  %s1310_s19 = sadd.s32 1, %s1956_s19   ;;  %s1956_s19 = sphi %s2363_s19, %s1310_s19   ;;  %s1952_s12 = sphi %s2361_s12, %s2491_s12   ;;  %s1948_s9 = sphi %s2488_s9, %s2490_s9   ;;  %s1944_s27 = sphi %s2487_s27, %s2489_s27  }
 0x2fb   : >> { %1317 = vst [vmem:[%s1944_s27] sm:$0xff] %v1316_v40  ;;  %1319 = vst [vmem:[%s1944_s27 + $0x8] sm:$0xff] %v1318_v42  ;;  %v1322_v43 = vld [vmem:[%s1948_s9 + $0x18] sm:$0xff]  ;;  %v1324_v44 = vld [vmem:[%s1948_s9 + $0x20] sm:$0xff]  ;;  %p1381_p11 = scmp.ge.s32.totalorder %s1380_s20, %s2352_s18  ;;  %p1309_p12 = scmp.ge.s32.totalorder %s1310_s19, %s2352_s18 }
 0x2fc   : >> { %1321 = vst [vmem:[%s1944_s27 + $0x10] sm:$0xff] %v1320_v35  ;;  %v1326_v45 = vld [vmem:[%s1948_s9 + $0x28] sm:$0xff]  ;;  %1323 = vst [vmem:[%s1944_s27 + $0x18] sm:$0xff] %v1322_v43  ;;  %v1328_v46 = vld [vmem:[%s1948_s9 + $0x30] sm:$0xff] }
 0x2fd   : >> { %1325 = vst [vmem:[%s1944_s27 + $0x20] sm:$0xff] %v1324_v44  ;;  %1327 = vst [vmem:[%s1944_s27 + $0x28] sm:$0xff] %v1326_v45  ;;  %v1330_v47 = vld [vmem:[%s1948_s9 + $0x38] sm:$0xff]  ;;  %v1332_v48 = vld [vmem:[%s1948_s9 + $0x40] sm:$0xff]  ;;  %s2498_s20 = smov (%p1381_p11, %s1380_s20), 0 }
 0x2fe   : >> { %1329 = vst [vmem:[%s1944_s27 + $0x30] sm:$0xff] %v1328_v46  ;;  %1331 = vst [vmem:[%s1944_s27 + $0x38] sm:$0xff] %v1330_v47  ;;  %v1334_v49 = vld [vmem:[%s1948_s9 + $0x48] sm:$0xff]  ;;  %v1336_v50 = vld [vmem:[%s1948_s9 + $0x50] sm:$0xff]  ;;  %s1565_s21 = sshll.u32 %s2498_s20, 8  ;;  %s2491_s12 = smov %s2498_s20 }
 0x2ff   : >> { %1333 = vst [vmem:[%s1944_s27 + $0x40] sm:$0xff] %v1332_v48  ;;  %v1338_v51 = vld [vmem:[%s1948_s9 + $0x58] sm:$0xff]  ;;  %1335 = vst [vmem:[%s1944_s27 + $0x48] sm:$0xff] %v1334_v49  ;;  %v1340_v0 = vld [vmem:[%s1948_s9 + $0x60] sm:$0xff]  ;;  %s2419_s22 = scalar_lea.vmem %s2243_s11, %s1565_s21 [#allocation2]   ;;  %s1386_s23 = scalar_lea.vmem %s2346_s16, %s1565_s21  }
 0x300   : >> { %1337 = vst [vmem:[%s1944_s27 + $0x50] sm:$0xff] %v1336_v50  ;;  %1339 = vst [vmem:[%s1944_s27 + $0x58] sm:$0xff] %v1338_v51  ;;  %v1342_v38 = vld [vmem:[%s1948_s9 + $0x68] sm:$0xff]  ;;  %v1344_v52 = vld [vmem:[%s1948_s9 + $0x70] sm:$0xff] }
 0x301   : >> { %1341 = vst [vmem:[%s1944_s27 + $0x60] sm:$0xff] %v1340_v0  ;;  %1343 = vst [vmem:[%s1944_s27 + $0x68] sm:$0xff] %v1342_v38  ;;  %v1346_v53 = vld [vmem:[%s1948_s9 + $0x78] sm:$0xff]  ;;  %v1348_v54 = vld [vmem:[%s1948_s9 + $0x80] sm:$0xff] }
 0x302   : >> { %1345 = vst [vmem:[%s1944_s27 + $0x70] sm:$0xff] %v1344_v52  ;;  %v1350_v55 = vld [vmem:[%s1948_s9 + $0x88] sm:$0xff]  ;;  %1347 = vst [vmem:[%s1944_s27 + $0x78] sm:$0xff] %v1346_v53  ;;  %v1352_v56 = vld [vmem:[%s1948_s9 + $0x90] sm:$0xff] }
 0x303   : >> { %1349 = vst [vmem:[%s1944_s27 + $0x80] sm:$0xff] %v1348_v54  ;;  %1351 = vst [vmem:[%s1944_s27 + $0x88] sm:$0xff] %v1350_v55  ;;  %v1354_v57 = vld [vmem:[%s1948_s9 + $0x98] sm:$0xff]  ;;  %v1356_v58 = vld [vmem:[%s1948_s9 + $0xa0] sm:$0xff] }
 0x304   : >> { %1353 = vst [vmem:[%s1944_s27 + $0x90] sm:$0xff] %v1352_v56  ;;  %1355 = vst [vmem:[%s1944_s27 + $0x98] sm:$0xff] %v1354_v57  ;;  %v1358_v59 = vld [vmem:[%s1948_s9 + $0xa8] sm:$0xff]  ;;  %v1360_v60 = vld [vmem:[%s1948_s9 + $0xb0] sm:$0xff]  ;;  %1312 = sbr.rel (!%p1309_p12) target bundleno = 762 (0x2fa), region = 138 }
 0x305   : >> { %1357 = vst [vmem:[%s1944_s27 + $0xa0] sm:$0xff] %v1356_v58  ;;  %v1362_v61 = vld [vmem:[%s1948_s9 + $0xb8] sm:$0xff]  ;;  %1359 = vst [vmem:[%s1944_s27 + $0xa8] sm:$0xff] %v1358_v59  ;;  %v1364_v62 = vld [vmem:[%s1948_s9 + $0xc0] sm:$0xff] }
 0x306   : >> { %1361 = vst [vmem:[%s1944_s27 + $0xb0] sm:$0xff] %v1360_v60  ;;  %1363 = vst [vmem:[%s1944_s27 + $0xb8] sm:$0xff] %v1362_v61  ;;  %v1366_v63 = vld [vmem:[%s1948_s9 + $0xc8] sm:$0xff]  ;;  %v1368_v1 = vld [vmem:[%s1948_s9 + $0xd0] sm:$0xff] }
 0x307   : >> { %1365 = vst [vmem:[%s1944_s27 + $0xc0] sm:$0xff] %v1364_v62  ;;  %1367 = vst [vmem:[%s1944_s27 + $0xc8] sm:$0xff] %v1366_v63  ;;  %v1370_v2 = vld [vmem:[%s1948_s9 + $0xd8] sm:$0xff]  ;;  %v1372_v3 = vld [vmem:[%s1948_s9 + $0xe0] sm:$0xff] }
 0x308   : >> { %1369 = vst [vmem:[%s1944_s27 + $0xd0] sm:$0xff] %v1368_v1  ;;  %v1374_v4 = vld [vmem:[%s1948_s9 + $0xe8] sm:$0xff]  ;;  %1371 = vst [vmem:[%s1944_s27 + $0xd8] sm:$0xff] %v1370_v2  ;;  %v1376_v5 = vld [vmem:[%s1948_s9 + $0xf0] sm:$0xff] }
 0x309   : >> { %1373 = vst [vmem:[%s1944_s27 + $0xe0] sm:$0xff] %v1372_v3  ;;  %1375 = vst [vmem:[%s1944_s27 + $0xe8] sm:$0xff] %v1374_v4  ;;  %v1378_v6 = vld [vmem:[%s1948_s9 + $0xf8] sm:$0xff]  ;;  %s2490_s9 = smov %s2419_s22 }
 0x30a   : >> { %1377 = vst [vmem:[%s1944_s27 + $0xf0] sm:$0xff] %v1376_v5  ;;  %1379 = vst [vmem:[%s1944_s27 + $0xf8] sm:$0xff] %v1378_v6  ;;  %s2489_s27 = smov %s1386_s23 }
 0x30b PF: > { %s2460_s26 = sand.u32 31, %s2496_s24   ;;  %s1576_s29 = sshll.u32 %s2352_s18, 8 }
 0x30c   : > { %s1391_s30 = scalar_lea.vmem %s2243_s11, %s1576_s29 [#allocation2]   ;;  %s1393_s10 = scalar_lea.vmem %s2346_s16, %s1576_s29  }
 0x30d   : > { %p1570_p13 = scmp.le.s32.totalorder %s2460_s26, 0 }
 0x30e   : > { %s1958_s13 = smov (!%p1570_p13), %s1393_s10   ;;  %s1962_s14 = smov (!%p1570_p13), %s1391_s30  }
 0x30f   : > { %1484 = sbr.rel (%p1570_p13) target bundleno = 800 (0x320), region = 143  ;;  %s1966_s15 = smov (!%p1570_p13), 0  }
 0x310   : > { %s1970_s17 = smov (!%p1570_p13), 0  }
 0x316 LB: >> { %v1403_v7 = vld [vmem:[%s1964_s14] sm:$0xff]  ;;  %s1405_s24 = sadd.s32 1, %s1968_s15  ;;  %s1397_s17 = sadd.s32 1, %s1972_s17   ;;  %s1972_s17 = sphi %s1970_s17, %s1397_s17   ;;  %s1968_s15 = sphi %s1966_s15, %s1967_s15   ;;  %s1964_s14 = sphi %s1962_s14, %s1410_s14   ;;  %s1960_s13 = sphi %s1958_s13, %s1411_s13  }
 0x317   : >> { %1404 = vst [vmem:[%s1960_s13] sm:$0xff] %v1403_v7  ;;  %p1406_p0 = scmp.ge.s32.totalorder %s1405_s24, %s2460_s26  ;;  %p1396_p1 = scmp.ge.s32.totalorder %s1397_s17, %s2460_s26 }
 0x319   : >> { %s2500_s24 = smov (%p1406_p0, %s1405_s24), 0  ;;  %1399 = sbr.rel (!%p1396_p1) target bundleno = 790 (0x316), region = 149 }
 0x31a   : >> { %s1571_s11 = sshll.u32 %s2500_s24, 3  ;;  %s1967_s15 = smov %s2500_s24  }
 0x31b   : >> { %s1410_s14 = scalar_lea.vmem %s1391_s30, %s1571_s11 [#allocation2]   ;;  %s1411_s13 = scalar_lea.vmem %s1393_s10, %s1571_s11  }
 0x320 PF: > { %p14_p2 = scmp.ge.s32.totalorder %s2029_s28, 4   ;;  %s2492_s24 = smov %s1936_s25 }
 0x321   : > { %s2493_s25 = smov %s2037_s8  ;;  %s2494_s26 = smov %s2029_s28 }
 0x322   :  { %16 = sbr.rel (!%p14_p2) target bundleno = 2 (0x2), region = 160 }

</bundles_post_ra>
